<compile_context>
chip_gen: v6e
topology: v6e:2x2x1
jax: 0.10.0
libtpu: 0.0.40
codegen_flags: <defaults>
</compile_context>

<pallas_src>
import jax
import jax.numpy as jnp
from jax.experimental import pallas as pl
from jax.experimental.pallas import tpu as pltpu


def _round_up(x, n):
    return ((x + n - 1) // n) * n


def _tlinear_stack_kernel(ha_ref, w1_ref, w2s_ref, r_ref):
    """Fused TLinear -> ReLU -> (Dropout=id) -> TLinear -> sum, TM measurements.

    ha_ref : (TM, H+2, TB)  measurement-major [H | A | 1] slab, batch on lanes
    w1_ref : (TM, H+2, D0)  cb-scaled TLinear#1 weights with b1 as the last row
    w2s_ref: (TM, 1,   D0)  TLinear#2 weights pre-summed over D1
    r_ref  : (1, TB)        lane-dense accumulator, resident across the mi axis
    """
    mi = pl.program_id(1)

    @pl.when(mi == 0)
    def _():
        r_ref[...] = jnp.zeros_like(r_ref)

    # TLinear #1 (bias carried by the constant-1 input row), batch on lanes.
    z1 = jnp.einsum("tio,tib->tob", w1_ref[...], ha_ref[...],
                    preferred_element_type=jnp.float32)        # (TM, D0, TB) f32
    z1 = jnp.maximum(z1, 0.0)     # ReLU; Dropout(0.1) = identity in eval mode.

    # TLinear #2 with the trailing sum over D1 folded into w2s = W2.sum(-1).
    contrib = jnp.einsum("tso,tob->tsb", w2s_ref[...], z1,
                         preferred_element_type=jnp.float32)   # (TM, 1, TB)

    # Sum over the TM measurements in this block (leading-axis VPU adds) and
    # accumulate into the resident lane-dense (1, TB) output.
    r_ref[...] += jnp.sum(contrib, axis=0)


def weight_nn_forward(X, A, params, *, tm=128, tb=128,
                      mxu_dtype=jnp.float32,
                      vmem_limit_bytes=48 * 1024 * 1024):
    """X: (B, M, V), A: (B, M)  ->  R: (B,)"""
    B, M, V = X.shape
    wl_t = params["w_lstm_t"]          # (V, H_dim)   (Linear weight, transposed)
    bl = params["b_lstm"]              # (H_dim,)
    w1 = params["w1"]                  # (M, H_dim+1, D0)
    b1 = params["b1"]                  # (M, D0)
    w2 = params["w2"]                  # (M, D0, D1)
    b2 = params["b2"]                  # (M, D1)
    beta = params["beta"]              # (1, M)

    h_dim = wl_t.shape[1]
    d0 = w1.shape[2]
    hp2 = h_dim + 2                    # [H | A | 1]

    # --- Shared dense prologue in XLA, emitted directly measurement-major ----
    # H_t[m, h, b] = (X @ Wl^T + bl)[b, m, h]; no separate transpose pass.
    H_t = jnp.einsum("bmv,vh->mhb", X, wl_t) + bl[None, :, None]       # (M, H, B)

    # Activation slab [H | A | 1]; the constant-1 row carries the TLinear#1 bias.
    ha = jnp.concatenate(
        [H_t, A.T[:, None, :], jnp.ones((M, 1, B), H_t.dtype)], axis=1)  # (M,H+2,B)

    # softmax(|beta|) folded into W1:  (cb * x) @ W1 == x @ (cb * W1).
    cb = jax.nn.softmax(jnp.abs(beta), axis=1).reshape(M, 1, 1)
    w1_eff = jnp.concatenate([w1 * cb, b1[:, None, :]], axis=1)        # (M, H+2, D0)

    # TLinear #2 + flatten(1).sum(1) folded:
    #   sum_d1(z1 @ W2 + b2) == z1 @ W2.sum(-1) + b2.sum()
    w2s = jnp.sum(w2, axis=2)[:, None, :]                              # (M, 1, D0)
    b2s = jnp.sum(b2)                                                  # scalar

    # --- Tiling / padding -----------------------------------------------------
    # Measurement blocks: tm multiple of 8 (sublane constraint on w2s/w1 blocks).
    tm = int(max(8, min(int(tm), _round_up(M, 8))))
    tm = _round_up(tm, 8)
    n_m = pl.cdiv(M, tm)
    Mp = n_m * tm

    # Batch tiles on lanes: multiple of 128; pad B with zeros (padded lanes
    # produce exactly 0 and are sliced away below).
    tb = _round_up(max(int(tb), 1), 128)
    n_b = pl.cdiv(B, tb)
    Bp = n_b * tb

    if Mp != M:  # zero weights/activations => padded measurements contribute 0
        pad_m = Mp - M
        ha = jnp.pad(ha, ((0, pad_m), (0, 0), (0, 0)))
        w1_eff = jnp.pad(w1_eff, ((0, pad_m), (0, 0), (0, 0)))
        w2s = jnp.pad(w2s, ((0, pad_m), (0, 0), (0, 0)))
    if Bp != B:
        ha = jnp.pad(ha, ((0, 0), (0, 0), (0, Bp - B)))

    if mxu_dtype != jnp.float32:
        # Cast only the MXU operands; accumulation / elementwise stay f32.
        ha = ha.astype(mxu_dtype)
        w1_eff = w1_eff.astype(mxu_dtype)

    out = pl.pallas_call(
        _tlinear_stack_kernel,
        out_shape=jax.ShapeDtypeStruct((1, Bp), jnp.float32),
        grid_spec=pltpu.PrefetchScalarGridSpec(
            num_scalar_prefetch=0,
            grid=(n_b, n_m),                      # measurement (reduction) axis last
            in_specs=[
                pl.BlockSpec((tm, hp2, tb), lambda bi, mi: (mi, 0, bi)),  # HA slab
                pl.BlockSpec((tm, hp2, d0), lambda bi, mi: (mi, 0, 0)),   # W1_eff
                pl.BlockSpec((tm, 1, d0), lambda bi, mi: (mi, 0, 0)),     # w2s
            ],
            out_specs=pl.BlockSpec((1, tb), lambda bi, mi: (0, bi)),      # lane-dense
        ),
        compiler_params=pltpu.CompilerParams(
            dimension_semantics=("parallel", "arbitrary"),
            vmem_limit_bytes=vmem_limit_bytes,
        ),
    )(ha, w1_eff, w2s)

    return out[0, :B] + b2s


def reference_forward(X, A, params):
    """Pure-JAX reference of the PyTorch forward pass (eval mode)."""
    B, M, V = X.shape
    H = X @ params["w_lstm_t"] + params["b_lstm"]                     # (B, M, H)
    cb = jax.nn.softmax(jnp.abs(params["beta"]), axis=1).reshape(M, 1)
    HA = jnp.concatenate([H, A[..., None]], axis=2) * cb              # (B, M, H+1)
    z1 = jnp.einsum("bmi,mio->bmo", HA, params["w1"]) + params["b1"]
    z1 = jnp.maximum(z1, 0.0)
    z2 = jnp.einsum("bmi,mio->bmo", z1, params["w2"]) + params["b2"]
    return z2.reshape(B, -1).sum(axis=1)


def init_params(key, *, num_measurements, num_variables, h_dim, hidden_dim):
    """Deterministic synthetic parameters matching the module's shapes."""
    ks = jax.random.split(key, 7)
    d0, d1 = hidden_dim
    return {
        # nn.Linear(num_variables, H_dim): weight (H_dim, V) stored transposed.
        "w_lstm_t": jax.random.uniform(ks[0], (num_variables, h_dim), jnp.float32,
                                       -0.3, 0.3),
        "b_lstm": jax.random.uniform(ks[1], (h_dim,), jnp.float32, -0.3, 0.3),
        # TLinear(H_dim+1, hidden_dim[0]): torch.rand-style uniform [0, 1).
        "w1": jax.random.uniform(ks[2], (num_measurements, h_dim + 1, d0),
                                 jnp.float32),
        "b1": jax.random.uniform(ks[3], (num_measurements, d0), jnp.float32),
        # TLinear(hidden_dim[0], hidden_dim[1]).
        "w2": jax.random.uniform(ks[4], (num_measurements, d0, d1), jnp.float32),
        "b2": jax.random.uniform(ks[5], (num_measurements, d1), jnp.float32),
        # nn.Parameter(torch.ones(1, M)); random values to exercise the softmax.
        "beta": jax.random.uniform(ks[6], (1, num_measurements), jnp.float32,
                                   0.5, 1.5),
    }


if __name__ == "__main__":
    # Small shapes implied by the forward pass.
    B = 2                  # batch
    M = 4                  # utils.num_measurements
    V = 8                  # utils.num_variables
    H_DIM = 16
    HIDDEN = (32, 16)

    key = jax.random.PRNGKey(0)
    k_x, k_a, k_p = jax.random.split(key, 3)

    X = jax.random.normal(k_x, (B, M, V), jnp.float32)
    A = jax.random.normal(k_a, (B, M), jnp.float32)
    params = init_params(k_p, num_measurements=M, num_variables=V,
                         h_dim=H_DIM, hidden_dim=HIDDEN)

    R = weight_nn_forward(X, A, params)
    R = jax.block_until_ready(R)

    R_ref = reference_forward(X, A, params)
    assert R.shape == (B,)
    assert jnp.allclose(R, R_ref, rtol=1e-4, atol=1e-4), (R, R_ref)

    print("KERNEL_OK")
</pallas_src>

<mosaic_0001>
module attributes {stable_mosaic.version = 11 : i64} {
  func.func @_tlinear_stack_kernel(%arg0: i32, %arg1: i32, %arg2: memref<8x18x128xf32, #tpu.memory_space<vmem>>, %arg3: memref<8x18x32xf32, #tpu.memory_space<vmem>>, %arg4: memref<8x1x32xf32, #tpu.memory_space<vmem>>, %arg5: memref<1x128xf32, #tpu.memory_space<vmem>>) attributes {dimension_semantics = [#tpu.dimension_semantics<parallel>, #tpu.dimension_semantics<arbitrary>], iteration_bounds = array<i64: 1, 1>, scalar_prefetch = 0 : i64, scratch_operands = 0 : i64, tpu.core_type = #tpu.core_type<tc>, window_params = [{transform_indices = @transform_0, window_bounds = array<i64: 8, 18, 128>}, {transform_indices = @transform_1, window_bounds = array<i64: 8, 18, 32>}, {transform_indices = @transform_2, window_bounds = array<i64: 8, 1, 32>}, {transform_indices = @transform_3, window_bounds = array<i64: 1, 128>}]} {
    %c0_i32 = arith.constant 0 : i32
    %0 = arith.cmpi eq, %arg1, %c0_i32 : i32
    %1 = arith.extui %0 : i1 to i32
    %c0_i32_0 = arith.constant 0 : i32
    %2 = arith.cmpi ne, %1, %c0_i32_0 : i32
    scf.if %2 {
      %cst_16 = arith.constant 0.000000e+00 : f32
      %14 = vector.broadcast %cst_16 : f32 to vector<1x128xf32>
      %c0_17 = arith.constant 0 : index
      %c0_18 = arith.constant 0 : index
      %15 = vector.load %arg5[%c0_17, %c0_18] : memref<1x128xf32, #tpu.memory_space<vmem>>, vector<1x128xf32>
      tpu.vector_store %arg5[%c0_17, %c0_18], %14 {strides = array<i32>} : memref<1x128xf32, #tpu.memory_space<vmem>>, vector<1x128xf32>,
    } else {
    }
    %c0 = arith.constant 0 : index
    %c0_1 = arith.constant 0 : index
    %c0_2 = arith.constant 0 : index
    %3 = vector.load %arg3[%c0, %c0_1, %c0_2] : memref<8x18x32xf32, #tpu.memory_space<vmem>>, vector<8x18x32xf32>
    %c0_3 = arith.constant 0 : index
    %c0_4 = arith.constant 0 : index
    %c0_5 = arith.constant 0 : index
    %4 = vector.load %arg2[%c0_3, %c0_4, %c0_5] : memref<8x18x128xf32, #tpu.memory_space<vmem>>, vector<8x18x128xf32>
    "tpu.trace_start"() <{level = 10 : i32, message = "tio,tib->tob"}> : () -> ()
    %cst = arith.constant dense<0.000000e+00> : vector<8x32x128xf32>
    %5 = tpu.matmul %3, %4, %cst {dimension_numbers = #tpu.dot_dimension_numbers<[1], [1], [2], [2], [0, 0, 0, 2, 1, 2], [0], [0]>} : vector<8x18x32xf32>, vector<8x18x128xf32>, vector<8x32x128xf32> -> vector<8x32x128xf32>
    "tpu.trace_stop"() : () -> ()
    %cst_6 = arith.constant 0.000000e+00 : f32
    %6 = vector.broadcast %cst_6 : f32 to vector<8x32x128xf32>
    %7 = arith.maximumf %5, %6 : vector<8x32x128xf32>
    %c0_7 = arith.constant 0 : index
    %c0_8 = arith.constant 0 : index
    %c0_9 = arith.constant 0 : index
    %8 = vector.load %arg4[%c0_7, %c0_8, %c0_9] : memref<8x1x32xf32, #tpu.memory_space<vmem>>, vector<8x1x32xf32>
    "tpu.trace_start"() <{level = 10 : i32, message = "tso,tob->tsb"}> : () -> ()
    %cst_10 = arith.constant dense<0.000000e+00> : vector<8x1x128xf32>
    %9 = tpu.matmul %8, %7, %cst_10 {dimension_numbers = #tpu.dot_dimension_numbers<[2], [1], [1], [2], [0, 0, 0, 1, 1, 2], [0], [0]>} : vector<8x1x32xf32>, vector<8x32x128xf32>, vector<8x1x128xf32> -> vector<8x1x128xf32>
    "tpu.trace_stop"() : () -> ()
    %c0_11 = arith.constant 0 : index
    %c0_12 = arith.constant 0 : index
    %10 = vector.load %arg5[%c0_11, %c0_12] : memref<1x128xf32, #tpu.memory_space<vmem>>, vector<1x128xf32>
    %cst_13 = arith.constant dense<0.000000e+00> : vector<1x128xf32>
    %11 = vector.multi_reduction <add>, %9, %cst_13 [0] : vector<8x1x128xf32> to vector<1x128xf32>
    %12 = arith.addf %10, %11 : vector<1x128xf32>
    %c0_14 = arith.constant 0 : index
    %c0_15 = arith.constant 0 : index
    %13 = vector.load %arg5[%c0_14, %c0_15] : memref<1x128xf32, #tpu.memory_space<vmem>>, vector<1x128xf32>
    tpu.vector_store %arg5[%c0_14, %c0_15], %12 {strides = array<i32>} : memref<1x128xf32, #tpu.memory_space<vmem>>, vector<1x128xf32>,
    return
  }
  func.func @transform_0(%arg0: i32, %arg1: i32) -> (i32, i32, i32) {
    %c0_i32 = arith.constant 0 : i32
    %c0_i32_0 = arith.constant 0 : i32
    return %arg1, %c0_i32, %arg0 : i32, i32, i32
  }
  func.func @transform_1(%arg0: i32, %arg1: i32) -> (i32, i32, i32) {
    %c0_i32 = arith.constant 0 : i32
    %c0_i32_0 = arith.constant 0 : i32
    %c0_i32_1 = arith.constant 0 : i32
    return %arg1, %c0_i32, %c0_i32_0 : i32, i32, i32
  }
  func.func @transform_2(%arg0: i32, %arg1: i32) -> (i32, i32, i32) {
    %c0_i32 = arith.constant 0 : i32
    %c0_i32_0 = arith.constant 0 : i32
    %c0_i32_1 = arith.constant 0 : i32
    return %arg1, %c0_i32, %c0_i32_0 : i32, i32, i32
  }
  func.func @transform_3(%arg0: i32, %arg1: i32) -> (i32, i32) {
    %c0_i32 = arith.constant 0 : i32
    %c0_i32_0 = arith.constant 0 : i32
    return %c0_i32, %arg0 : i32, i32
  }
}

</mosaic_0001>

<bundles_post_ra>
// kernel: tpu_custom_call.1
= control target key start
LH: loop header
LB: loop body
LE: loop exit
PB: predicated region body
PF: predicated region fallthrough
CT: control target
= control target key end

     0   :  { %vm113_vm0 = vcmask 1041408   ;;  %s2444_s0 = inlined_call_operand.vmem [shape: f32[8,18,128], index: 0, kind: input, shape index: {}]   ;;  %s2445_s1 = inlined_call_operand.vmem [shape: f32[8,18,32], index: 1, kind: input, shape index: {}]   ;;  %s2446_s2 = inlined_call_operand.vmem [shape: f32[8,1,32], index: 2, kind: input, shape index: {}]   ;;  %s2447_s3 = inlined_call_operand.hbm [shape: f32[1,128], index: 3, kind: output, shape index: {}]  }
   0x1   :  { %v23_v0 = vld [vmem:[%s2445_s1 + $0x18] sm:$0xff]  ;;  %v20_v1 = vld [vmem:[%s2445_s1] sm:$0xff]  ;;  %v21_v3 = vld [vmem:[%s2445_s1 + $0x8] sm:$0xff] }
   0x2   :  { %202 = vxpose.xlu1.b32.start [1/3] (short) (narrow) %v23_v0, 32  ;;  %68 = vxpose.xlu0.b32.start [1/3] (short) (narrow) %v20_v1, 32  ;;  %v24_v2 = vld [vmem:[%s2445_s1 + $0x20] sm:$0xff]  ;;  %v25_v4 = vld [vmem:[%s2445_s1 + $0x28] sm:$0x3] }
   0x3   :  { %v22_v5 = vld [vmem:[%s2445_s1 + $0x10] sm:$0x3]  ;;  %v49_v7 = vld [vmem:[%s2444_s0 + $0x28] sm:$0x3]  ;;  %v48_v9 = vld [vmem:[%s2444_s0 + $0x20] sm:$0xff] }
   0x4   :  { %v46_v6 = vld [vmem:[%s2444_s0 + $0x10] sm:$0x3]  ;;  %v45_v8 = vld [vmem:[%s2444_s0 + $0x8] sm:$0xff]  ;;  %1940 = vmatprep.subr.msk.mxu1 %vm113_vm0, %v49_v7 }
   0x5   :  { %1928 = vmatprep.subr.msk.mxu0 %vm113_vm0, %v46_v6 }
   0x6   :  { %203 = vxpose.xlu1.b32.cont [2/3] (short) (narrow) %v24_v2, 32  ;;  %69 = vxpose.xlu0.b32.cont [2/3] (short) (narrow) %v21_v3, 32 }
   0xa   :  { %204 = vxpose.xlu1.b32.end [3/3] (short) (narrow) %v25_v4, 32  ;;  %70 = vxpose.xlu0.b32.end [3/3] (short) (narrow) %v22_v5, 32 }
   0xb   :  { %8 = vsyncpa [#allocation3], 0  ;;  %v29_v10 = vld [vmem:[%s2445_s1 + $0x48] sm:$0xff]  ;;  %v26_v11 = vld [vmem:[%s2445_s1 + $0x30] sm:$0xff]  ;;  %1929 = vmatpush3.msk.msra.mxu0 %vm113_vm0, %v46_v6  ;;  %1941 = vmatpush3.msk.msra.mxu1 %vm113_vm0, %v49_v7  ;;  %vm100_vm1 = vcmask 146432   ;;  %vm2138_vm2 = vmmov 0  }
   0xc   :  { %1930 = vmatprep.subr.mxu0 %v45_v8  ;;  %1942 = vmatprep.subr.mxu1 %v48_v9  ;;  %v44_v12 = vld [vmem:[%s2444_s0] sm:$0xff]  ;;  %v47_v13 = vld [vmem:[%s2444_s0 + $0x18] sm:$0xff]  ;;  %v30_v16 = vld [vmem:[%s2445_s1 + $0x50] sm:$0xff]  ;;  %vm1166_vm3 = vcmask 261120   ;;  %vm1752_vm4 = vcmask 1040384  }
   0xd   :  { %1931 = vmatpush3.msra.mxu0 %v45_v8  ;;  %1943 = vmatpush3.msra.mxu1 %v48_v9  ;;  %v52_v14 = vld [vmem:[%s2444_s0 + $0x40] sm:$0x3]  ;;  %v55_v15 = vld [vmem:[%s2444_s0 + $0x58] sm:$0x3]  ;;  %v33_v23 = vld [vmem:[%s2445_s1 + $0x68] sm:$0xff] }
   0xe   :  { %v27_v17 = vld [vmem:[%s2445_s1 + $0x38] sm:$0xff]  ;;  %1932 = vmatprep.subr.mxu0 %v44_v12  ;;  %1944 = vmatprep.subr.mxu1 %v47_v13  ;;  %v28_v19 = vld [vmem:[%s2445_s1 + $0x40] sm:$0x3]  ;;  %v37_v24 = vld [vmem:[%s2445_s1 + $0x88] sm:$0x3] }
   0xf   :  { %466 = vxpose.xlu1.b32.start [1/3] (short) (narrow) %v29_v10, 32  ;;  %334 = vxpose.xlu0.b32.start [1/3] (short) (narrow) %v26_v11, 32  ;;  %v31_v18 = vld [vmem:[%s2445_s1 + $0x58] sm:$0x3]  ;;  %v32_v21 = vld [vmem:[%s2445_s1 + $0x60] sm:$0xff]  ;;  %v41_v26 = vld [vmem:[%s2445_s1 + $0xa8] sm:$0xff] }
  0x10   :  { %1933 = vmatpush3.msra.mxu0 %v44_v12  ;;  %1945 = vmatpush3.msra.mxu1 %v47_v13  ;;  %v35_v20 = vld [vmem:[%s2445_s1 + $0x78] sm:$0xff]  ;;  %v36_v22 = vld [vmem:[%s2445_s1 + $0x80] sm:$0xff]  ;;  %v34_v25 = vld [vmem:[%s2445_s1 + $0x70] sm:$0x3] }
  0x11   :  { %1952 = vmatprep.subr.msk.mxu0 %vm113_vm0, %v52_v14  ;;  %1964 = vmatprep.subr.msk.mxu1 %vm113_vm0, %v55_v15  ;;  %v38_v27 = vld [vmem:[%s2445_s1 + $0x90] sm:$0xff]  ;;  %v39_v29 = vld [vmem:[%s2445_s1 + $0x98] sm:$0xff]  ;;  %v40_v31 = vld [vmem:[%s2445_s1 + $0xa0] sm:$0x3] }
  0x12   :  { %v42_v28 = vld [vmem:[%s2445_s1 + $0xb0] sm:$0xff]  ;;  %v43_v30 = vld [vmem:[%s2445_s1 + $0xb8] sm:$0x3]  ;;  %v53_v39 = vld [vmem:[%s2444_s0 + $0x48] sm:$0xff] }
  0x13   :  { %467 = vxpose.xlu1.b32.cont [2/3] (short) (narrow) %v30_v16, 32  ;;  %335 = vxpose.xlu0.b32.cont [2/3] (short) (narrow) %v27_v17, 32  ;;  %v51_v36 = vld [vmem:[%s2444_s0 + $0x38] sm:$0xff]  ;;  %v54_v37 = vld [vmem:[%s2444_s0 + $0x50] sm:$0xff]  ;;  %v61_v43 = vld [vmem:[%s2444_s0 + $0x88] sm:$0x3] }
  0x14   :  { %v50_v38 = vld [vmem:[%s2444_s0 + $0x30] sm:$0xff]  ;;  %v57_v50 = vld [vmem:[%s2444_s0 + $0x68] sm:$0xff]  ;;  %v60_v51 = vld [vmem:[%s2444_s0 + $0x80] sm:$0xff]  ;;  %v2137_v16 = vmov 0.0  }
  0x15   :  { %v58_v42 = vld [vmem:[%s2444_s0 + $0x70] sm:$0x3]  ;;  %v56_v52 = vld [vmem:[%s2444_s0 + $0x60] sm:$0xff]  ;;  %v59_v53 = vld [vmem:[%s2444_s0 + $0x78] sm:$0xff]  ;;  %19 = vst [vmem:[#allocation2] sm:$0x1] %v2137_v16 }
  0x16   :  { %v64_v56 = vld [vmem:[%s2444_s0 + $0xa0] sm:$0x3]  ;;  %v67_v57 = vld [vmem:[%s2444_s0 + $0xb8] sm:$0x3]  ;;  %v66_v1 = vld [vmem:[%s2444_s0 + $0xb0] sm:$0xff] }
  0x17   :  { %468 = vxpose.xlu1.b32.end [3/3] (short) (narrow) %v31_v18, 32  ;;  %336 = vxpose.xlu0.b32.end [3/3] (short) (narrow) %v28_v19, 32  ;;  %v63_v0 = vld [vmem:[%s2444_s0 + $0x98] sm:$0xff]  ;;  %v62_v2 = vld [vmem:[%s2444_s0 + $0x90] sm:$0xff]  ;;  %v65_v3 = vld [vmem:[%s2444_s0 + $0xa8] sm:$0xff] }
  0x1c   :  { %730 = vxpose.xlu1.b32.start [1/3] (short) (narrow) %v35_v20, 32  ;;  %598 = vxpose.xlu0.b32.start [1/3] (short) (narrow) %v32_v21, 32 }
  0x20   :  { %731 = vxpose.xlu1.b32.cont [2/3] (short) (narrow) %v36_v22, 32  ;;  %599 = vxpose.xlu0.b32.cont [2/3] (short) (narrow) %v33_v23, 32 }
  0x24   :  { %732 = vxpose.xlu1.b32.end [3/3] (short) (narrow) %v37_v24, 32  ;;  %600 = vxpose.xlu0.b32.end [3/3] (short) (narrow) %v34_v25, 32 }
  0x29   :  { %994 = vxpose.xlu1.b32.start [1/3] (short) (narrow) %v41_v26, 32  ;;  %862 = vxpose.xlu0.b32.start [1/3] (short) (narrow) %v38_v27, 32 }
  0x2d   :  { %995 = vxpose.xlu1.b32.cont [2/3] (short) (narrow) %v42_v28, 32  ;;  %863 = vxpose.xlu0.b32.cont [2/3] (short) (narrow) %v39_v29, 32 }
  0x31   :  { %996 = vxpose.xlu1.b32.end [3/3] (short) (narrow) %v43_v30, 32  ;;  %864 = vxpose.xlu0.b32.end [3/3] (short) (narrow) %v40_v31, 32 }
  0x7e   :  { %v218_v32 = vpop.trf.xlu1  ;;  %v84_v33 = vpop.trf.xlu0 }
  0x7f   :  { %1934 = vmatprep.mubr.msk.f32.mxu0 %vm100_vm1, %v84_v33  ;;  %1946 = vmatprep.mubr.msk.f32.mxu1 %vm100_vm1, %v218_v32  ;;  %v1158_v33 = vld [vmem:[%s2446_s2] sm:$0x1] }
  0x82   :  { %v219_v34 = vpop.trf.xlu1  ;;  %v85_v35 = vpop.trf.xlu0 }
  0x83   :  { %1935 = vmatmul.mubr.msk.f32.vlgmr.msra.gmra.mxu0 %vm100_vm1, %v85_v35  ;;  %1947 = vmatmul.mubr.msk.f32.vlgmr.msra.gmra.mxu1 %vm100_vm1, %v219_v34  ;;  %v1159_v34 = vld [vmem:[%s2446_s2 + $0x1] sm:$0x1] }
  0x84   :  { %1965 = vmatpush3.msk.msra.mxu1 %vm113_vm0, %v55_v15  ;;  %1953 = vmatpush3.msk.msra.mxu0 %vm113_vm0, %v52_v14 }
  0x85   :  { %1954 = vmatprep.subr.mxu0 %v51_v36  ;;  %1966 = vmatprep.subr.mxu1 %v54_v37 }
  0x86   :  { %v220_v40 = vpop.trf.xlu1  ;;  %v86_v41 = vpop.trf.xlu0  ;;  %1955 = vmatpush3.msra.mxu0 %v51_v36  ;;  %1967 = vmatpush3.msra.mxu1 %v54_v37 }
  0x87   :  { %1937 = vmatprep.mubr.msk.f32.mxu0 %vm100_vm1, %v86_v41  ;;  %1949 = vmatprep.mubr.msk.f32.mxu1 %vm100_vm1, %v220_v40 }
  0x88   :  { %1956 = vmatprep.subr.mxu0 %v50_v38  ;;  %1968 = vmatprep.subr.mxu1 %v53_v39 }
  0x89   :  { %1969 = vmatpush3.msra.mxu1 %v53_v39  ;;  %1957 = vmatpush3.msra.mxu0 %v50_v38 }
  0x8a   :  { %v221_v44 = vpop.trf.xlu1  ;;  %v87_v45 = vpop.trf.xlu0  ;;  %1976 = vmatprep.subr.msk.mxu0 %vm113_vm0, %v58_v42  ;;  %1988 = vmatprep.subr.msk.mxu1 %vm113_vm0, %v61_v43 }
  0x8b   :  { %1938 = vmatmul.mubr.msk.f32.gmra.mxu0 %vm100_vm1, %v87_v45  ;;  %1950 = vmatmul.mubr.msk.f32.gmra.mxu1 %vm100_vm1, %v221_v44 }
  0x8e   :  { %v482_v46 = vpop.trf.xlu1  ;;  %v350_v47 = vpop.trf.xlu0 }
  0x8f   :  { %1958 = vmatprep.mubr.msk.f32.mxu0 %vm100_vm1, %v350_v47  ;;  %1970 = vmatprep.mubr.msk.f32.mxu1 %vm100_vm1, %v482_v46 }
  0x92   :  { %v483_v48 = vpop.trf.xlu1  ;;  %v351_v49 = vpop.trf.xlu0 }
  0x93   :  { %1959 = vmatmul.mubr.msk.f32.vlgmr.msra.gmra.mxu0 %vm100_vm1, %v351_v49  ;;  %1971 = vmatmul.mubr.msk.f32.vlgmr.msra.gmra.mxu1 %vm100_vm1, %v483_v48 }
  0x94   :  { %1989 = vmatpush3.msk.msra.mxu1 %vm113_vm0, %v61_v43  ;;  %1977 = vmatpush3.msk.msra.mxu0 %vm113_vm0, %v58_v42 }
  0x95   :  { %1978 = vmatprep.subr.mxu0 %v57_v50  ;;  %1990 = vmatprep.subr.mxu1 %v60_v51 }
  0x96   :  { %v484_v54 = vpop.trf.xlu1  ;;  %v352_v55 = vpop.trf.xlu0  ;;  %1979 = vmatpush3.msra.mxu0 %v57_v50  ;;  %1991 = vmatpush3.msra.mxu1 %v60_v51  ;;  %v1160_v51 = vld [vmem:[%s2446_s2 + $0x2] sm:$0x1] }
  0x97   :  { %1961 = vmatprep.mubr.msk.f32.mxu0 %vm100_vm1, %v352_v55  ;;  %1973 = vmatprep.mubr.msk.f32.mxu1 %vm100_vm1, %v484_v54 }
  0x98   :  { %1980 = vmatprep.subr.mxu0 %v56_v52  ;;  %1992 = vmatprep.subr.mxu1 %v59_v53 }
  0x99   :  { %1993 = vmatpush3.msra.mxu1 %v59_v53  ;;  %1981 = vmatpush3.msra.mxu0 %v56_v52  ;;  %v1161_v52 = vld [vmem:[%s2446_s2 + $0x3] sm:$0x1] }
  0x9a   :  { %v485_v58 = vpop.trf.xlu1  ;;  %v353_v59 = vpop.trf.xlu0  ;;  %2000 = vmatprep.subr.msk.mxu0 %vm113_vm0, %v64_v56  ;;  %2012 = vmatprep.subr.msk.mxu1 %vm113_vm0, %v67_v57 }
  0x9b   :  { %1962 = vmatmul.mubr.msk.f32.gmra.mxu0 %vm100_vm1, %v353_v59  ;;  %1974 = vmatmul.mubr.msk.f32.gmra.mxu1 %vm100_vm1, %v485_v58 }
  0x9e   :  { %v746_v60 = vpop.trf.xlu1  ;;  %v614_v61 = vpop.trf.xlu0 }
  0x9f   :  { %1982 = vmatprep.mubr.msk.f32.mxu0 %vm100_vm1, %v614_v61  ;;  %1994 = vmatprep.mubr.msk.f32.mxu1 %vm100_vm1, %v746_v60 }
  0xa2   :  { %v747_v62 = vpop.trf.xlu1  ;;  %v615_v63 = vpop.trf.xlu0 }
  0xa3   :  { %1983 = vmatmul.mubr.msk.f32.vlgmr.msra.gmra.mxu0 %vm100_vm1, %v615_v63  ;;  %1995 = vmatmul.mubr.msk.f32.vlgmr.msra.gmra.mxu1 %vm100_vm1, %v747_v62 }
  0xa4   :  { %2013 = vmatpush3.msk.msra.mxu1 %vm113_vm0, %v67_v57  ;;  %2001 = vmatpush3.msk.msra.mxu0 %vm113_vm0, %v64_v56 }
  0xa5   :  { %2002 = vmatprep.subr.mxu0 %v63_v0  ;;  %2014 = vmatprep.subr.mxu1 %v66_v1 }
  0xa6   :  { %v748_v4 = vpop.trf.xlu1  ;;  %v616_v5 = vpop.trf.xlu0  ;;  %2003 = vmatpush3.msra.mxu0 %v63_v0  ;;  %2015 = vmatpush3.msra.mxu1 %v66_v1 }
  0xa7   :  { %1985 = vmatprep.mubr.msk.f32.mxu0 %vm100_vm1, %v616_v5  ;;  %1997 = vmatprep.mubr.msk.f32.mxu1 %vm100_vm1, %v748_v4  ;;  %v1162_v5 = vld [vmem:[%s2446_s2 + $0x4] sm:$0x1] }
  0xa8   :  { %2004 = vmatprep.subr.mxu0 %v62_v2  ;;  %2016 = vmatprep.subr.mxu1 %v65_v3 }
  0xa9   :  { %2017 = vmatpush3.msra.mxu1 %v65_v3  ;;  %2005 = vmatpush3.msra.mxu0 %v62_v2 }
  0xaa   :  { %v749_v6 = vpop.trf.xlu1  ;;  %v617_v7 = vpop.trf.xlu0  ;;  %2024 = vmatprep.subr.mxu0 %v2137_v16  ;;  %2035 = vmatprep.subr.mxu1 %v2137_v16 }
  0xab   :  { %1986 = vmatmul.mubr.msk.f32.gmra.mxu0 %vm100_vm1, %v617_v7  ;;  %1998 = vmatmul.mubr.msk.f32.gmra.mxu1 %vm100_vm1, %v749_v6  ;;  %v1163_v6 = vld [vmem:[%s2446_s2 + $0x5] sm:$0x1] }
  0xae   :  { %v1010_v8 = vpop.trf.xlu1  ;;  %v878_v9 = vpop.trf.xlu0 }
  0xaf   :  { %2006 = vmatprep.mubr.msk.f32.mxu0 %vm100_vm1, %v878_v9  ;;  %2018 = vmatprep.mubr.msk.f32.mxu1 %vm100_vm1, %v1010_v8 }
  0xb2   :  { %v1011_v10 = vpop.trf.xlu1  ;;  %v879_v11 = vpop.trf.xlu0 }
  0xb3   :  { %2007 = vmatmul.mubr.msk.f32.vlgmr.msra.gmra.mxu0 %vm100_vm1, %v879_v11  ;;  %2019 = vmatmul.mubr.msk.f32.vlgmr.msra.gmra.mxu1 %vm100_vm1, %v1011_v10 }
  0xb6   :  { %v1012_v12 = vpop.trf.xlu1  ;;  %v880_v13 = vpop.trf.xlu0 }
  0xb7   :  { %2009 = vmatprep.mubr.msk.f32.mxu0 %vm100_vm1, %v880_v13  ;;  %2021 = vmatprep.mubr.msk.f32.mxu1 %vm100_vm1, %v1012_v12 }
  0xba   :  { %v1013_v14 = vpop.trf.xlu1  ;;  %v881_v15 = vpop.trf.xlu0 }
  0xbb   :  { %2010 = vmatmul.mubr.msk.f32.gmra.mxu0 %vm100_vm1, %v881_v15  ;;  %2022 = vmatmul.mubr.msk.f32.gmra.mxu1 %vm100_vm1, %v1013_v14 }
  0xbc   :  { %2032 = vmatprep.mubr.msk.f32.mxu0 %vm2138_vm2, %v2137_v16  ;;  %2043 = vmatprep.mubr.msk.f32.mxu1 %vm2138_vm2, %v2137_v16 }
 0x143   :  { %v1936_v17 = vpop.f32.mrf.mxu0  ;;  %v1948_v18 = vpop.f32.mrf.mxu1 }
 0x144   :  { %v1127_v29 = vmax.f32 %v1936_v17, 0.0  ;;  %v1131_v30 = vmax.f32 %v1948_v18, 0.0 }
 0x145   :  { %v183_v19 = vpop.f32.mrf.mxu0  ;;  %v315_v20 = vpop.f32.mrf.mxu1 }
 0x146   :  { %v1126_v31 = vmax.f32 %v183_v19, 0.0  ;;  %v1130_v32 = vmax.f32 %v315_v20, 0.0 }
 0x14b   :  { %v1939_v21 = vpop.f32.mrf.mxu0  ;;  %v1951_v22 = vpop.f32.mrf.mxu1 }
 0x14c   :  { %v1129_v23 = vmax.f32 %v1939_v21, 0.0  ;;  %v1133_v24 = vmax.f32 %v1951_v22, 0.0 }
 0x14d   :  { %v193_v25 = vpop.f32.mrf.mxu0  ;;  %v325_v26 = vpop.f32.mrf.mxu1 }
 0x14e   :  { %v1128_v27 = vmax.f32 %v193_v25, 0.0  ;;  %v1132_v28 = vmax.f32 %v325_v26, 0.0  ;;  %2025 = vmatpush3.msra.mxu0 %v1129_v23  ;;  %2036 = vmatpush3.msra.mxu1 %v1133_v24  ;;  %v1164_v24 = vld [vmem:[%s2446_s2 + $0x6] sm:$0x1]  ;;  %v1165_v25 = vld [vmem:[%s2446_s2 + $0x7] sm:$0x1] }
 0x14f   :  { %2026 = vmatprep.subr.mxu0 %v2137_v16  ;;  %2037 = vmatprep.subr.mxu1 %v2137_v16  ;;  %s2139_s2 = smov [#allocation2]  }
 0x150   :  { %2027 = vmatpush3.msra.mxu0 %v1128_v27  ;;  %2038 = vmatpush3.msra.mxu1 %v1132_v28  ;;  %s1776_s13 = sshll.u32 %s2139_s2, 4  ;;  %s1777_s13 = int_to_ptr.vmem [resolvable:$true] %s1776_s13 }
 0x151   :  { %2028 = vmatprep.subr.mxu0 %v2137_v16  ;;  %2039 = vmatprep.subr.mxu1 %v2137_v16  ;;  %s2115_s14 = scalar_lea.vmem %s1777_s13, 16  ;;  %s2119_s15 = scalar_lea.vmem %s1777_s13, 32 }
 0x152   :  { %2029 = vmatpush3.msra.mxu0 %v1127_v29  ;;  %2040 = vmatpush3.msra.mxu1 %v1131_v30  ;;  %p2116_p0 = scmp.ne.s32.totalorder %s1777_s13, %s2115_s14  ;;  %p2120_p1 = scmp.lt.s32.totalorder %s1777_s13, %s1777_s13 }
 0x153   :  { %2030 = vmatprep.subr.mxu0 %v2137_v16  ;;  %2041 = vmatprep.subr.mxu1 %v2137_v16  ;;  %v1960_v35 = vpop.f32.mrf.mxu0  ;;  %v1972_v36 = vpop.f32.mrf.mxu1  ;;  %p2121_p2 = scmp.lt.s32.totalorder %s2119_s15, %s2115_s14 }
 0x154   :  { %2031 = vmatpush3.msra.mxu0 %v1126_v31  ;;  %2042 = vmatpush3.msra.mxu1 %v1130_v32  ;;  %v1135_v47 = vmax.f32 %v1960_v35, 0.0  ;;  %v1139_v48 = vmax.f32 %v1972_v36, 0.0 }
 0x155   :  { %2046 = vmatprep.subr.mxu0 %v2137_v16  ;;  %2057 = vmatprep.subr.mxu1 %v2137_v16  ;;  %v447_v37 = vpop.f32.mrf.mxu0  ;;  %v579_v38 = vpop.f32.mrf.mxu1  ;;  %p2122_p3 = por %p2121_p2, %p2120_p1 }
 0x156   :  { %2033 = vmatmul.mubr.msk.f32.vlgmr.msra.gmra.mxu0 %vm1166_vm3, %v1158_v33  ;;  %2044 = vmatmul.mubr.msk.f32.vlgmr.msra.gmra.mxu1 %vm1166_vm3, %v1159_v34  ;;  %v1134_v49 = vmax.f32 %v447_v37, 0.0  ;;  %v1138_v50 = vmax.f32 %v579_v38, 0.0 }
 0x157   :  { %2054 = vmatprep.mubr.msk.f32.mxu0 %vm2138_vm2, %v2137_v16  ;;  %2065 = vmatprep.mubr.msk.f32.mxu1 %vm2138_vm2, %v2137_v16  ;;  %p2123_p4 = pnand %p2122_p3, %p2116_p0 }
 0x15b   :  { %v1963_v39 = vpop.f32.mrf.mxu0  ;;  %v1975_v40 = vpop.f32.mrf.mxu1 }
 0x15c   :  { %v1137_v41 = vmax.f32 %v1963_v39, 0.0  ;;  %v1141_v42 = vmax.f32 %v1975_v40, 0.0 }
 0x15d   :  { %v457_v43 = vpop.f32.mrf.mxu0  ;;  %v589_v44 = vpop.f32.mrf.mxu1 }
 0x15e   :  { %v1136_v45 = vmax.f32 %v457_v43, 0.0  ;;  %v1140_v46 = vmax.f32 %v589_v44, 0.0  ;;  %2047 = vmatpush3.msra.mxu0 %v1137_v41  ;;  %2058 = vmatpush3.msra.mxu1 %v1141_v42 }
 0x15f   :  { %2048 = vmatprep.subr.mxu0 %v2137_v16  ;;  %2059 = vmatprep.subr.mxu1 %v2137_v16 }
 0x160   :  { %2049 = vmatpush3.msra.mxu0 %v1136_v45  ;;  %2060 = vmatpush3.msra.mxu1 %v1140_v46 }
 0x161   :  { %2050 = vmatprep.subr.mxu0 %v2137_v16  ;;  %2061 = vmatprep.subr.mxu1 %v2137_v16 }
 0x162   :  { %2051 = vmatpush3.msra.mxu0 %v1135_v47  ;;  %2062 = vmatpush3.msra.mxu1 %v1139_v48 }
 0x163   :  { %2052 = vmatprep.subr.mxu0 %v2137_v16  ;;  %2063 = vmatprep.subr.mxu1 %v2137_v16  ;;  %v1984_v53 = vpop.f32.mrf.mxu0  ;;  %v1996_v54 = vpop.f32.mrf.mxu1 }
 0x164   :  { %2053 = vmatpush3.msra.mxu0 %v1134_v49  ;;  %2064 = vmatpush3.msra.mxu1 %v1138_v50  ;;  %v1143_v1 = vmax.f32 %v1984_v53, 0.0  ;;  %v1147_v2 = vmax.f32 %v1996_v54, 0.0 }
 0x165   :  { %2068 = vmatprep.subr.mxu0 %v2137_v16  ;;  %2079 = vmatprep.subr.mxu1 %v2137_v16  ;;  %v711_v55 = vpop.f32.mrf.mxu0  ;;  %v843_v56 = vpop.f32.mrf.mxu1 }
 0x166   :  { %2055 = vmatmul.mubr.msk.f32.vlgmr.msra.gmra.mxu0 %vm1166_vm3, %v1160_v51  ;;  %2066 = vmatmul.mubr.msk.f32.vlgmr.msra.gmra.mxu1 %vm1166_vm3, %v1161_v52  ;;  %v1142_v3 = vmax.f32 %v711_v55, 0.0  ;;  %v1146_v4 = vmax.f32 %v843_v56, 0.0  ;;  %v1751_v55 = vld [vmem:[#allocation2] sm:$0x1] }
 0x167   :  { %2076 = vmatprep.mubr.msk.f32.mxu0 %vm2138_vm2, %v2137_v16  ;;  %2087 = vmatprep.mubr.msk.f32.mxu1 %vm2138_vm2, %v2137_v16 }
 0x16b   :  { %v1987_v57 = vpop.f32.mrf.mxu0  ;;  %v1999_v58 = vpop.f32.mrf.mxu1 }
 0x16c   :  { %v1145_v59 = vmax.f32 %v1987_v57, 0.0  ;;  %v1149_v60 = vmax.f32 %v1999_v58, 0.0 }
 0x16d   :  { %v721_v61 = vpop.f32.mrf.mxu0  ;;  %v853_v62 = vpop.f32.mrf.mxu1 }
 0x16e   :  { %v1144_v63 = vmax.f32 %v721_v61, 0.0  ;;  %v1148_v0 = vmax.f32 %v853_v62, 0.0  ;;  %2069 = vmatpush3.msra.mxu0 %v1145_v59  ;;  %2080 = vmatpush3.msra.mxu1 %v1149_v60 }
 0x16f   :  { %2070 = vmatprep.subr.mxu0 %v2137_v16  ;;  %2081 = vmatprep.subr.mxu1 %v2137_v16 }
 0x170   :  { %2071 = vmatpush3.msra.mxu0 %v1144_v63  ;;  %2082 = vmatpush3.msra.mxu1 %v1148_v0 }
 0x171   :  { %2072 = vmatprep.subr.mxu0 %v2137_v16  ;;  %2083 = vmatprep.subr.mxu1 %v2137_v16 }
 0x172   :  { %2073 = vmatpush3.msra.mxu0 %v1143_v1  ;;  %2084 = vmatpush3.msra.mxu1 %v1147_v2 }
 0x173   :  { %2074 = vmatprep.subr.mxu0 %v2137_v16  ;;  %2085 = vmatprep.subr.mxu1 %v2137_v16  ;;  %v2008_v7 = vpop.f32.mrf.mxu0  ;;  %v2020_v8 = vpop.f32.mrf.mxu1 }
 0x174   :  { %2075 = vmatpush3.msra.mxu0 %v1142_v3  ;;  %2086 = vmatpush3.msra.mxu1 %v1146_v4  ;;  %v1151_v20 = vmax.f32 %v2008_v7, 0.0  ;;  %v1155_v21 = vmax.f32 %v2020_v8, 0.0 }
 0x175   :  { %2077 = vmatmul.mubr.msk.f32.vlgmr.msra.gmra.mxu0 %vm1166_vm3, %v1162_v5  ;;  %2088 = vmatmul.mubr.msk.f32.vlgmr.msra.gmra.mxu1 %vm1166_vm3, %v1163_v6  ;;  %v975_v9 = vpop.f32.mrf.mxu0  ;;  %v1107_v10 = vpop.f32.mrf.mxu1 }
 0x176   :  { %2090 = vmatprep.subr.mxu0 %v2137_v16  ;;  %2101 = vmatprep.subr.mxu1 %v2137_v16  ;;  %v1150_v22 = vmax.f32 %v975_v9, 0.0  ;;  %v1154_v23 = vmax.f32 %v1107_v10, 0.0 }
 0x177   :  { %2098 = vmatprep.mubr.msk.f32.mxu0 %vm2138_vm2, %v2137_v16  ;;  %2109 = vmatprep.mubr.msk.f32.mxu1 %vm2138_vm2, %v2137_v16 }
 0x17b   :  { %v2011_v11 = vpop.f32.mrf.mxu0  ;;  %v2023_v12 = vpop.f32.mrf.mxu1 }
 0x17c   :  { %v1153_v13 = vmax.f32 %v2011_v11, 0.0  ;;  %v1157_v14 = vmax.f32 %v2023_v12, 0.0 }
 0x17d   :  { %v985_v15 = vpop.f32.mrf.mxu0  ;;  %v1117_v17 = vpop.f32.mrf.mxu1 }
 0x17e   :  { %v1152_v18 = vmax.f32 %v985_v15, 0.0  ;;  %v1156_v19 = vmax.f32 %v1117_v17, 0.0  ;;  %2091 = vmatpush3.msra.mxu0 %v1153_v13  ;;  %2102 = vmatpush3.msra.mxu1 %v1157_v14 }
 0x17f   :  { %2092 = vmatprep.subr.mxu0 %v2137_v16  ;;  %2103 = vmatprep.subr.mxu1 %v2137_v16 }
 0x180   :  { %2093 = vmatpush3.msra.mxu0 %v1152_v18  ;;  %2104 = vmatpush3.msra.mxu1 %v1156_v19 }
 0x181   :  { %2094 = vmatprep.subr.mxu0 %v2137_v16  ;;  %2105 = vmatprep.subr.mxu1 %v2137_v16 }
 0x182   :  { %2095 = vmatpush3.msra.mxu0 %v1151_v20  ;;  %2106 = vmatpush3.msra.mxu1 %v1155_v21 }
 0x183   :  { %2096 = vmatprep.subr.mxu0 %v2137_v16  ;;  %2107 = vmatprep.subr.mxu1 %v2137_v16 }
 0x184   :  { %2097 = vmatpush3.msra.mxu0 %v1150_v22  ;;  %2108 = vmatpush3.msra.mxu1 %v1154_v23 }
 0x185   :  { %2099 = vmatmul.mubr.msk.f32.vlgmr.msra.gmra.mxu0 %vm1166_vm3, %v1164_v24  ;;  %2110 = vmatmul.mubr.msk.f32.vlgmr.msra.gmra.mxu1 %vm1166_vm3, %v1165_v25 }
 0x216   :  { %v1236_v26 = vpop.f32.mrf.mxu0  ;;  %v1309_v27 = vpop.f32.mrf.mxu1 }
 0x217   :  { %v1753_v34 = vsel %vm1752_vm4, %v1236_v26, 0.0  ;;  %v1754_v35 = vsel %vm1752_vm4, %v1309_v27, 0.0 }
 0x218   :  { %v2034_v28 = vpop.f32.mrf.mxu0  ;;  %v2045_v29 = vpop.f32.mrf.mxu1  ;;  %v1755_v16 = vadd.f32 %v1754_v35, %v1753_v34 }
 0x226   :  { %v1382_v30 = vpop.f32.mrf.mxu0  ;;  %v1455_v31 = vpop.f32.mrf.mxu1 }
 0x227   :  { %v1756_v38 = vsel %vm1752_vm4, %v1382_v30, 0.0  ;;  %v1758_v42 = vsel %vm1752_vm4, %v1455_v31, 0.0 }
 0x228   :  { %v2056_v32 = vpop.f32.mrf.mxu0  ;;  %v2067_v33 = vpop.f32.mrf.mxu1  ;;  %v1757_v41 = vadd.f32 %v1756_v38, %v1755_v16 }
 0x22a   :  { %v1759_v43 = vadd.f32 %v1758_v42, %v1757_v41 }
 0x235   :  { %v1528_v36 = vpop.f32.mrf.mxu0  ;;  %v1601_v37 = vpop.f32.mrf.mxu1 }
 0x236   :  { %v1760_v44 = vsel %vm1752_vm4, %v1528_v36, 0.0  ;;  %v1762_v46 = vsel %vm1752_vm4, %v1601_v37, 0.0 }
 0x237   :  { %v2078_v39 = vpop.f32.mrf.mxu0  ;;  %v2089_v40 = vpop.f32.mrf.mxu1  ;;  %v1761_v45 = vadd.f32 %v1760_v44, %v1759_v43 }
 0x239   :  { %v1763_v47 = vadd.f32 %v1762_v46, %v1761_v45 }
 0x245   :  { %v1674_v48 = vpop.f32.mrf.mxu0  ;;  %v1747_v49 = vpop.f32.mrf.mxu1 }
 0x246   :  { %v1764_v50 = vsel %vm1752_vm4, %v1674_v48, 0.0  ;;  %v1766_v51 = vsel %vm1752_vm4, %v1747_v49, 0.0 }
 0x247   :  { %v1765_v52 = vadd.f32 %v1764_v50, %v1763_v47  ;;  %v2100_v53 = vpop.f32.mrf.mxu0  ;;  %v2111_v54 = vpop.f32.mrf.mxu1 }
 0x249   :  { %v1767_v56 = vadd.f32 %v1766_v51, %v1765_v52 }
 0x24b   :  { %v1768_v57 = vadd.f32 %v1767_v56, %v1751_v55 }
 0x24d   :  { %1769 = vst [vmem:[#allocation2] sm:$0x1] %v1768_v57 }
 0x24e   :  { %2126 = shalt.err (!%p2123_p4)
}
 0x24f   :  { %1779 = dma.vmem_to_hbm [thread:$0]  %s1777_s13, 16, %s2447_s3, [#allocation3]  }
 0x250   :  { %2135 = dma.done.wait [#allocation3], 16  }
 0x251   :  { %2136 = vsyncadd [#allocation3], 4294967280 }
 0x252   :  { %1783 = vsyncpa [#allocation3], 1 }

</bundles_post_ra>
